<compile_context>
chip_gen: v6e
topology: v6e:2x2x1
jax: 0.10.0
libtpu: 0.0.40
codegen_flags: <defaults>
</compile_context>

<pallas_src>
import jax
import jax.numpy as jnp
from jax.experimental import pallas as pl
from jax.experimental.pallas import tpu as pltpu


def _round_up(x, m):
    return ((x + m - 1) // m) * m


def residual_ffn_kernel(x_ref, w_ref, b_ref, o_ref):
    """out = GELU(x @ W + b) + x   (the `fn(x) + x` residual pattern)."""
    x = x_ref[...]                                      # (TM, Hp) f32 row tile
    # MXU matmul: bf16 inputs, f32 accumulation.  W arrives already bf16.
    h = jnp.dot(x.astype(jnp.bfloat16), w_ref[...],
                preferred_element_type=jnp.float32)
    h = jax.nn.gelu(h + b_ref[...])                     # bias already f32 (1, Hp)
    o_ref[...] = (h + x).astype(o_ref.dtype)            # residual add in f32


def residual_forward(x, w, b, *, tm=512):
    """x: (B, S, H) f32; w: (H, H); b: (H,).  Returns fn(x) + x, fn = GELU∘Linear."""
    B, S, H = x.shape
    M = B * S

    # Lane-dense hidden dim: pad to a multiple of 128 (TPU lane width).
    Hp = _round_up(H, 128)

    # Row tile: multiple of 8 (f32 sublane), shrunk until the VMEM budget
    # (double-buffered x/out tiles + resident bf16 W + bias) fits ~56 MiB
    # so the same config survives v7x's 64 MiB VMEM.
    VMEM_CAP = 56 << 20

    def _budget(tm_):
        return (2 * 2 * tm_ * Hp * 4          # x + out tiles, double-buffered, f32
                + Hp * Hp * 2                 # W, bf16, resident across row tiles
                + Hp * 4                      # bias
                + (2 << 20))                  # slack for compiler temporaries

    TM = _round_up(max(8, min(tm, M)), 8)
    while TM > 8 and _budget(TM) > VMEM_CAP:
        TM = _round_up(max(8, TM // 2), 8)
    Mp = _round_up(M, TM)
    grid = (Mp // TM,)

    # Wrapper-side layout/dtype plumbing (padding + casts) — only when needed,
    # so aligned inputs incur zero extra HBM traffic outside the kernel.
    xm = x.reshape(M, H)
    if (Mp, Hp) != (M, H):
        x2 = jnp.zeros((Mp, Hp), x.dtype).at[:M, :H].set(xm)
    else:
        x2 = xm

    w_bf = w.astype(jnp.bfloat16)
    b_f32 = b.astype(jnp.float32)
    if Hp != H:
        w2 = jnp.zeros((Hp, Hp), jnp.bfloat16).at[:H, :H].set(w_bf)
        b2 = jnp.zeros((1, Hp), jnp.float32).at[:, :H].set(b_f32)
    else:
        w2 = w_bf
        b2 = b_f32.reshape(1, Hp)

    vmem_limit = min(max(_budget(TM), 16 << 20), VMEM_CAP)

    cost = pl.CostEstimate(
        flops=2 * Mp * Hp * Hp + 6 * Mp * Hp,
        transcendentals=Mp * Hp,                          # GELU
        bytes_accessed=Mp * Hp * 4 * 2 + Hp * Hp * 2 + Hp * 4,
    )

    out = pl.pallas_call(
        residual_ffn_kernel,
        out_shape=jax.ShapeDtypeStruct((Mp, Hp), x.dtype),
        grid_spec=pltpu.PrefetchScalarGridSpec(
            num_scalar_prefetch=0,
            grid=grid,
            in_specs=[
                pl.BlockSpec((TM, Hp), lambda i: (i, 0)),   # x row tile (pipelined)
                pl.BlockSpec((Hp, Hp), lambda i: (0, 0)),   # W, VMEM-resident
                pl.BlockSpec((1, Hp), lambda i: (0, 0)),    # bias, VMEM-resident
            ],
            out_specs=pl.BlockSpec((TM, Hp), lambda i: (i, 0)),
        ),
        compiler_params=pltpu.CompilerParams(
            dimension_semantics=("parallel",),   # row tiles shard across TCs (v7x)
            vmem_limit_bytes=vmem_limit,
        ),
        cost_estimate=cost,
    )(x2, w2, b2)

    if (Mp, Hp) != (M, H):
        out = out[:M, :H]
    return out.reshape(B, S, H)


if __name__ == "__main__":
    # Small shapes, but lane-dense hidden (H % 128 == 0) so the fast,
    # zero-padding wrapper path is exercised.
    B, S, H = 2, 256, 128
    key = jax.random.PRNGKey(0)
    kx, kw, kb = jax.random.split(key, 3)

    x = jax.random.normal(kx, (B, S, H), dtype=jnp.float32)
    # Deterministic parameters for fn (dense layer), scaled like nn.Linear.
    w = jax.random.normal(kw, (H, H), dtype=jnp.float32) / jnp.sqrt(H)
    b = jax.random.normal(kb, (H,), dtype=jnp.float32) * 0.01

    # tm=128 -> 4 row tiles, exercising the pipelined grid even at test size.
    out = residual_forward(x, w, b, tm=128)
    jax.block_until_ready(out)

    # Reference: Residual semantics fn(x) + x, fn = GELU(Linear).
    ref = jax.nn.gelu(jnp.einsum("bsh,hk->bsk", x, w) + b) + x
    assert out.shape == x.shape and out.dtype == x.dtype
    # bf16 MXU inputs (f32 accumulation) => loose elementwise tolerance.
    err = float(jnp.max(jnp.abs(out - ref)))
    assert jnp.allclose(out, ref, atol=5e-2, rtol=5e-2), err

    print("KERNEL_OK")
</pallas_src>

<mosaic_0001>
module attributes {stable_mosaic.version = 11 : i64} {
  func.func @residual_ffn_kernel(%arg0: i32, %arg1: memref<128x128xf32, #tpu.memory_space<vmem>>, %arg2: memref<128x128xbf16, #tpu.memory_space<vmem>>, %arg3: memref<1x128xf32, #tpu.memory_space<vmem>>, %arg4: memref<128x128xf32, #tpu.memory_space<vmem>>) attributes {dimension_semantics = [#tpu.dimension_semantics<parallel>], iteration_bounds = array<i64: 4>, scalar_prefetch = 0 : i64, scratch_operands = 0 : i64, tpu.core_type = #tpu.core_type<tc>, window_params = [{transform_indices = @transform_0, window_bounds = array<i64: 128, 128>}, {pipeline_mode = #tpu.pipeline_mode<synchronous>, transform_indices = @transform_1, window_bounds = array<i64: 128, 128>}, {pipeline_mode = #tpu.pipeline_mode<synchronous>, transform_indices = @transform_2, window_bounds = array<i64: 1, 128>}, {transform_indices = @transform_3, window_bounds = array<i64: 128, 128>}]} {
    %c0 = arith.constant 0 : index
    %c0_0 = arith.constant 0 : index
    %0 = vector.load %arg1[%c0, %c0_0] : memref<128x128xf32, #tpu.memory_space<vmem>>, vector<128x128xf32>
    %1 = arith.truncf %0 : vector<128x128xf32> to vector<128x128xbf16>
    %c0_1 = arith.constant 0 : index
    %c0_2 = arith.constant 0 : index
    %2 = vector.load %arg2[%c0_1, %c0_2] : memref<128x128xbf16, #tpu.memory_space<vmem>>, vector<128x128xbf16>
    %cst = arith.constant dense<0.000000e+00> : vector<128x128xf32>
    %3 = tpu.matmul %1, %2, %cst {dimension_numbers = #tpu.dot_dimension_numbers<[1], [0], [0], [1], [0, 0, 1, 1], [], []>} : vector<128x128xbf16>, vector<128x128xbf16>, vector<128x128xf32> -> vector<128x128xf32>
    %c0_3 = arith.constant 0 : index
    %c0_4 = arith.constant 0 : index
    %4 = vector.load %arg3[%c0_3, %c0_4] : memref<1x128xf32, #tpu.memory_space<vmem>>, vector<1x128xf32>
    %5 = vector.broadcast %4 : vector<1x128xf32> to vector<128x128xf32>
    %6 = arith.addf %3, %5 : vector<128x128xf32>
    %7 = arith.mulf %6, %6 : vector<128x128xf32>
    %8 = arith.mulf %6, %7 : vector<128x128xf32>
    %cst_5 = arith.constant 4.471500e-02 : f32
    %9 = vector.broadcast %cst_5 : f32 to vector<128x128xf32>
    %10 = arith.mulf %9, %8 : vector<128x128xf32>
    %11 = arith.addf %6, %10 : vector<128x128xf32>
    %cst_6 = arith.constant 0.797884583 : f32
    %12 = vector.broadcast %cst_6 : f32 to vector<128x128xf32>
    %13 = arith.mulf %12, %11 : vector<128x128xf32>
    %14 = math.tanh %13 : vector<128x128xf32>
    %cst_7 = arith.constant 1.000000e+00 : f32
    %15 = vector.broadcast %cst_7 : f32 to vector<128x128xf32>
    %16 = arith.addf %15, %14 : vector<128x128xf32>
    %cst_8 = arith.constant 5.000000e-01 : f32
    %17 = vector.broadcast %cst_8 : f32 to vector<128x128xf32>
    %18 = arith.mulf %17, %16 : vector<128x128xf32>
    %19 = arith.mulf %6, %18 : vector<128x128xf32>
    %20 = arith.addf %19, %0 : vector<128x128xf32>
    %c0_9 = arith.constant 0 : index
    %c0_10 = arith.constant 0 : index
    %21 = vector.load %arg4[%c0_9, %c0_10] : memref<128x128xf32, #tpu.memory_space<vmem>>, vector<128x128xf32>
    tpu.vector_store %arg4[%c0_9, %c0_10], %20 {strides = array<i32>} : memref<128x128xf32, #tpu.memory_space<vmem>>, vector<128x128xf32>,
    return
  }
  func.func @transform_0(%arg0: i32) -> (i32, i32) {
    %c0_i32 = arith.constant 0 : i32
    %c0_i32_0 = arith.constant 0 : i32
    return %arg0, %c0_i32 : i32, i32
  }
  func.func @transform_1(%arg0: i32) -> (i32, i32) {
    %c0_i32 = arith.constant 0 : i32
    %c0_i32_0 = arith.constant 0 : i32
    %c0_i32_1 = arith.constant 0 : i32
    return %c0_i32, %c0_i32_0 : i32, i32
  }
  func.func @transform_2(%arg0: i32) -> (i32, i32) {
    %c0_i32 = arith.constant 0 : i32
    %c0_i32_0 = arith.constant 0 : i32
    %c0_i32_1 = arith.constant 0 : i32
    return %c0_i32, %c0_i32_0 : i32, i32
  }
  func.func @transform_3(%arg0: i32) -> (i32, i32) {
    %c0_i32 = arith.constant 0 : i32
    %c0_i32_0 = arith.constant 0 : i32
    return %arg0, %c0_i32 : i32, i32
  }
}

</mosaic_0001>

<bundles_post_ra>
// kernel: tpu_custom_call.1
= control target key start
LH: loop header
LB: loop body
LE: loop exit
PB: predicated region body
PF: predicated region fallthrough
CT: control target
= control target key end

     0   :  { %8 = vsyncpa [#allocation3], 0  ;;  %s1432_s0 = inlined_call_operand.hbm [shape: f32[512,128], index: 0, kind: input, shape index: {}]   ;;  %s1433_s1 = inlined_call_operand.hbm [shape: bf16[128,128], index: 1, kind: input, shape index: {}]   ;;  %s1434_s2 = inlined_call_operand.vmem [shape: f32[1,128], index: 2, kind: input, shape index: {}]   ;;  %s1435_s3 = inlined_call_operand.hbm [shape: f32[512,128], index: 3, kind: output, shape index: {}]  }
   0x1   :  { %10 = vsyncpa [#allocation3 + $0x1], 0 }
   0x2   :  { %11 = vsyncpa [#allocation6], 0 }
   0x3   :  { %12 = vsyncpa [#allocation4], 0 }
   0x4   :  { %14 = vsyncpa [#allocation4 + $0x1], 0  ;;  %s1019_s12 = smov 0   ;;  %s1021_s13 = smov 0  }
   0x5   :  { %s1023_s14 = smov 0   ;;  %s1025_s15 = smov 0  }
   0x6 LB: > { %s1040_s16 = sadd.s32 4294967295, %s988_s15   ;;  %s672_s17 = sadd.s32 4294967294, %s988_s15   ;;  %s988_s15 = sphi %s1025_s15, %s1456_s15   ;;  %s984_s14 = sphi %s1023_s14, %s1455_s14   ;;  %s980_s13 = sphi %s1021_s13, %s1454_s13   ;;  %s976_s12 = sphi %s1019_s12, %s1453_s12  }
   0x7   : > { %p40_p0 = scmp.ne.s32.totalorder %s980_s13, %s976_s12  ;;  %p1436_p1 = scmp.eq.s32.totalorder %s1040_s16, 0 }
   0x8   : > { %p112_p3 = scmp.eq.s32.totalorder %s672_s17, 3  ;;  %p673_p5 = scmp.ge.s32.totalorder %s988_s15, 1 }
   0x9   : > { %p1049_p4 = por %p1436_p1, %p40_p0  ;;  %p119_p7 = scmp.lt.s32.totalorder %s988_s15, 5 }
   0xa   : > { %p1054_p6 = por %p112_p3, %p40_p0  ;;  %s990_s21 = smov [#allocation5]  }
   0xb   : > { %s1440_s18 = scalar_select %p1049_p4, 1, 0 }
   0xc   : > { %s1441_s19 = scalar_select %p1054_p6, 1, 0 }
   0xd   : > { %p1059_p8 = pnand %p673_p5, %p119_p7  ;;  %s131_s22 = sshll.u32 %s990_s21, 4  ;;  %s132_s22 = int_to_ptr.vmem [resolvable:$true] %s131_s22 }
   0xe   : > { %s1072_s24 = sadd.s32 1, %s988_s15   ;;  %s27_s25 = sadd.s32 1, %s984_s14 }
   0xf   : > { %s1442_s20 = scalar_select %p1059_p8, 1, 0 }
  0x10   : > { %p771_p9 = pneg %p1059_p8  ;;  %s24_s26 = ssub.s32 %s988_s15, %s1072_s24 }
  0x11   : > { %s877_s27 = scalar_lea.vmem %s132_s22, 1024  ;;  %p885_p3 = scmp.lt.s32.totalorder %s132_s22, %s132_s22 }
  0x12   : > { %p1067_p10 = pnand %p771_p9, %p1436_p1  ;;  %p878_p12 = scmp.ne.s32.totalorder %s132_s22, %s877_s27 }
  0x13   : > { %p886_p5 = scmp.lt.s32.totalorder %s877_s27, %s877_s27 }
  0x14   : > { %p868_p11 = pneg %p1067_p10 }
  0x15   : > { %p887_p7 = por %p886_p5, %p885_p3 }
  0x16   : > { %p880_p13 = pnand %p878_p12, %p868_p11 }
  0x18   : > { %p881_p0 = pneg %p880_p13 }
  0x1a   : > { %p888_p2 = pnand %p887_p7, %p881_p0 }
  0x1c   : > { %891 = shalt.err (!%p888_p2)
}
  0x1d   : > { %s991_s28 = smov 64   ;;  %s992_s29 = smov 4  }
  0x1e   : > { %774 = dma.hbm_to_vmem [thread:$0]  (!%p1067_p10), %s1433_s1, 1024, %s132_s22, [#allocation6], %s991_s28, %s991_s28, %s992_s29  }
  0x1f   : > { %p25_p9 = scmp.eq.s32.totalorder %s24_s26, 0  ;;  %p34_p11 = scmp.ne.s32.totalorder %s984_s14, %s980_s13 }
  0x20   : > { %p35_p12 = scmp.eq.s32.totalorder %s988_s15, 0  ;;  %p784_p2 = scmp.lt.s32.totalorder %s988_s15, 4 }
  0x21   : > { %s1089_s5 = scalar_select %p25_p9, %s984_s14, %s27_s25  }
  0x22   : > { %p36_p13 = por %p35_p12, %p34_p11  ;;  %p1444_p0 = scmp.eq.s32.totalorder %s1040_s16, 3 }
  0x23   : > { %s148_s7 = sand.u32 1, %s984_s14   ;;  %s697_s8 = sshll.u32 %s988_s15, 11 }
  0x24   : > { %p1093_p3 = por %p1444_p0, %p34_p11  ;;  %s676_s9 = sshll.u32 %s148_s7, 7 }
  0x25   : > { %s1102_s17 = scalar_lea.hbm %s1432_s0, %s697_s8  ;;  %s152_s21 = scalar_lea.vmem [#allocation2], %s676_s9 }
  0x26   : > { %s1445_s6 = scalar_select %p1093_p3, 1, 0 }
  0x27   : > { %s159_s22 = sshll.u32 %s152_s21, 4  ;;  %p1104_p10 = pnand %p784_p2, %p36_p13  ;;  %s1108_s22 = int_to_ptr.vmem [resolvable:$true] %s159_s22 }
  0x28   : > { %s1110_s25 = scalar_lea.sflag [#allocation3], %s148_s7  ;;  %s892_s26 = scalar_lea.hbm %s1102_s17, 2048 }
  0x29   : > { %p893_p5 = scmp.ne.s32.totalorder %s1102_s17, %s892_s26  ;;  %p894_p7 = pneg %p1104_p10 }
  0x2a   : > { %s897_s29 = scalar_lea.hbm %s1432_s0, 8192  ;;  %p898_p12 = scmp.lt.s32.totalorder %s1102_s17, %s1432_s0 }
  0x2b   : > { %p895_p9 = pnand %p894_p7, %p893_p5  ;;  %p899_p2 = scmp.lt.s32.totalorder %s897_s29, %s892_s26 }
  0x2d   : > { %p896_p11 = pneg %p895_p9  ;;  %p900_p13 = por %p899_p2, %p898_p12 }
  0x2f   : > { %p901_p0 = pnand %p900_p13, %p896_p11 }
  0x31   : > { %904 = shalt.err (!%p901_p0)
}
  0x32   : > { %s905_s7 = scalar_lea.vmem %s1108_s22, 2048  ;;  %s993_s8 = smov [#allocation2]  }
  0x33   : > { %p906_p1 = scmp.ne.s32.totalorder %s1108_s22, %s905_s7  ;;  %s910_s9 = sshll.u32 %s993_s8, 4  ;;  %s911_s9 = int_to_ptr.vmem [resolvable:$false] %s910_s9 }
  0x34   : > { %s912_s10 = scalar_lea.vmem %s911_s9, 4096  ;;  %p913_p9 = scmp.lt.s32.totalorder %s1108_s22, %s911_s9 }
  0x35   : > { %p908_p6 = pnand %p906_p1, %p894_p7  ;;  %p914_p3 = scmp.lt.s32.totalorder %s912_s10, %s905_s7 }
  0x37   : > { %p909_p5 = pneg %p908_p6  ;;  %p915_p4 = por %p914_p3, %p913_p9 }
  0x39   : > { %p916_p8 = pnand %p915_p4, %p909_p5 }
  0x3b   : > { %919 = shalt.err (!%p916_p8)
}
  0x3c   : > { %s994_s11 = smov 128   ;;  %s995_s21 = smov 8  }
  0x3d   : > { %778 = dma.hbm_to_vmem [thread:$0]  (!%p1104_p10), %s1102_s17, 2048, %s1108_s22, %s1110_s25, %s994_s11, %s994_s11, %s995_s21  }
  0x3e   : > { %p1447_p1 = scmp.ne.s32.totalorder %s1442_s20, 0 }
  0x3f   : > { %s1134_s26 = sand.u32 (!%p1447_p1), 1, %s980_s13   ;;  %p1448_p4 = scmp.ne.s32.totalorder (!%p1447_p1), %s1440_s18, 0 }
  0x40   : > { %171 = sbr.rel (%p1447_p1) target bundleno = 376 (0x178), region = 32  ;;  %s680_s27 = sshll.u32 (!%p1447_p1), %s1134_s26, 7 }
  0x41   : > { %s174_s28 = scalar_lea.sflag (!%p1447_p1), [#allocation3], %s1134_s26  ;;  %s1140_s29 = scalar_lea.vmem (!%p1447_p1), [#allocation2], %s680_s27 }
  0x45   : > { %963 = dma.done.wait (%p1448_p4), %s174_s28, 2048  }
  0x46   : > { %965 = vsyncadd (%p1448_p4), %s174_s28, 4294965248  ;;  %p1449_p6 = scmp.eq.s32.totalorder %s1040_s16, 0 }
  0x48   : > { %967 = dma.done.wait (%p1449_p6), [#allocation6], 1024   ;;  %p1450_p8 = pmov %p1449_p6 }
  0x49   : > { %v826_v0 = vld [vmem:[#allocation5 + $0x38] sm:$0xff]   ;;  %v827_v1 = vld [vmem:[#allocation5 + $0x30] sm:$0xff]   ;;  %v828_v2 = vld [vmem:[#allocation5 + $0x28] sm:$0xff]   ;;  %s1337_s17 = scalar_lea.vmem [#allocation7], %s680_s27  ;;  %s698_s22 = sshll.u32 %s1040_s16, 11 }
  0x4a   : > { %969 = vsyncadd (%p1450_p8), [#allocation6], 4294966272  ;;  %715 = vmatprep.subr.bf16.mxu0 %v826_v0  ;;  %747 = vmatprep.subr.bf16.mxu1 %v826_v0  ;;  %v829_v3 = vld [vmem:[#allocation5 + $0x20] sm:$0xff]   ;;  %v1154_v5 = vld [vmem:[%s1140_s29 + $0x8] sm:$0xff]  ;;  %s589_s23 = sshll.u32 %s1337_s17, 4  ;;  %s1386_s4 = scalar_lea.hbm %s1435_s3, %s698_s22  ;;  %s1388_s23 = int_to_ptr.vmem [resolvable:$true] %s589_s23 }
  0x4b   : > { %716 = vmatpush3.bf16.msra.mxu0 %v826_v0  ;;  %755 = vmatpush3.bf16.msra.mxu1 %v826_v0  ;;  %v1151_v4 = vld [vmem:[%s1140_s29] sm:$0xff]  ;;  %v1162_v8 = vld [vmem:[%s1140_s29 + $0x48] sm:$0xff]  ;;  %v830_v10 = vld [vmem:[#allocation5 + $0x18] sm:$0xff]   ;;  %s576_s16 = scalar_lea.sflag [#allocation4], %s1134_s26  ;;  %s920_s7 = scalar_lea.vmem %s1388_s23, 2048 }
  0x4c   : > { %717 = vmatprep.subr.bf16.mxu0 %v827_v1  ;;  %748 = vmatprep.subr.bf16.mxu1 %v827_v1  ;;  %v1157_v6 = vld [vmem:[%s1140_s29 + $0x40] sm:$0xff]  ;;  %v223_v7 = vpack.c.bf16 %v1154_v5, %v1151_v4  ;;  %v831_v11 = vld [vmem:[#allocation5 + $0x10] sm:$0xff]   ;;  %v832_v12 = vld [vmem:[#allocation5 + $0x8] sm:$0xff]   ;;  %p921_p3 = scmp.ne.s32.totalorder %s1388_s23, %s920_s7  ;;  %p1451_p10 = scmp.ne.s32.totalorder %s1445_s6, 0 }
  0x4d   : > { %v227_v9 = vpack.c.bf16 %v1162_v8, %v1157_v6  ;;  %v833_v13 = vld [vmem:[#allocation5] sm:$0xff]   ;;  %v1167_v14 = vld [vmem:[%s1140_s29 + $0x10] sm:$0xff]  ;;  %v1170_v15 = vld [vmem:[%s1140_s29 + $0x18] sm:$0xff]  ;;  %s996_s8 = smov [#allocation7]  }
  0x4e   : > { %731 = vmatprep.mubr.bf16.mxu0 %v223_v7  ;;  %v1173_v16 = vld [vmem:[%s1140_s29 + $0x50] sm:$0xff]  ;;  %v1176_v17 = vld [vmem:[%s1140_s29 + $0x58] sm:$0xff]  ;;  %v1179_v18 = vld [vmem:[%s1140_s29 + $0x20] sm:$0xff]  ;;  %v224_v22 = vpack.c.bf16 %v1170_v15, %v1167_v14  ;;  %p922_p7 = pnand %p921_p3, %p1451_p10  ;;  %s924_s9 = sshll.u32 %s996_s8, 4  ;;  %s925_s9 = int_to_ptr.vmem [resolvable:$false] %s924_s9 }
  0x4f   : > { %718 = vmatpush3.bf16.msra.mxu0 %v827_v1  ;;  %756 = vmatpush3.bf16.msra.mxu1 %v827_v1  ;;  %v1182_v19 = vld [vmem:[%s1140_s29 + $0x28] sm:$0xff]  ;;  %v1185_v20 = vld [vmem:[%s1140_s29 + $0x60] sm:$0xff]  ;;  %v228_v23 = vpack.c.bf16 %v1176_v17, %v1173_v16  ;;  %v1199_v26 = vld [vmem:[%s1140_s29 + $0x30] sm:$0xff]  ;;  %s926_s10 = scalar_lea.vmem %s925_s9, 4096  ;;  %p927_p12 = scmp.lt.s32.totalorder %s1388_s23, %s925_s9 }
  0x50   : > { %719 = vmatprep.subr.bf16.mxu0 %v828_v2  ;;  %749 = vmatprep.subr.bf16.mxu1 %v828_v2  ;;  %v1188_v21 = vld [vmem:[%s1140_s29 + $0x68] sm:$0xff]  ;;  %v225_v24 = vpack.c.bf16 %v1182_v19, %v1179_v18  ;;  %v1202_v27 = vld [vmem:[%s1140_s29 + $0x38] sm:$0xff]  ;;  %v1205_v28 = vld [vmem:[%s1140_s29 + $0x70] sm:$0xff]  ;;  %p923_p11 = pneg %p922_p7  ;;  %p928_p2 = scmp.lt.s32.totalorder %s926_s10, %s920_s7 }
  0x51   : > { %739 = vmatprep.mubr.bf16.mxu1 %v227_v9  ;;  %v229_v25 = vpack.c.bf16 %v1188_v21, %v1185_v20  ;;  %v1208_v29 = vld [vmem:[%s1140_s29 + $0x78] sm:$0xff]  ;;  %v226_v30 = vpack.c.bf16 %v1202_v27, %v1199_v26  ;;  %v1217_v32 = vld [vmem:[%s1434_s2] ss:$0 sm:$0xff] }
  0x52   : > { %v230_v31 = vpack.c.bf16 %v1208_v29, %v1205_v28  ;;  %p929_p13 = por %p928_p2, %p927_p12 }
  0x53   : > { %720 = vmatpush3.bf16.msra.mxu0 %v828_v2  ;;  %757 = vmatpush3.bf16.msra.mxu1 %v828_v2 }
  0x54   : > { %721 = vmatprep.subr.bf16.mxu0 %v829_v3  ;;  %750 = vmatprep.subr.bf16.mxu1 %v829_v3  ;;  %p930_p0 = pnand %p929_p13, %p923_p11 }
  0x57   : > { %722 = vmatpush3.bf16.msra.mxu0 %v829_v3  ;;  %758 = vmatpush3.bf16.msra.mxu1 %v829_v3 }
  0x58   : > { %723 = vmatprep.subr.bf16.mxu0 %v830_v10  ;;  %751 = vmatprep.subr.bf16.mxu1 %v830_v10 }
  0x5b   : > { %724 = vmatpush3.bf16.msra.mxu0 %v830_v10  ;;  %759 = vmatpush3.bf16.msra.mxu1 %v830_v10 }
  0x5c   : > { %725 = vmatprep.subr.bf16.mxu0 %v831_v11  ;;  %752 = vmatprep.subr.bf16.mxu1 %v831_v11 }
  0x5f   : > { %726 = vmatpush3.bf16.msra.mxu0 %v831_v11  ;;  %760 = vmatpush3.bf16.msra.mxu1 %v831_v11 }
  0x60   : > { %727 = vmatprep.subr.bf16.mxu0 %v832_v12  ;;  %753 = vmatprep.subr.bf16.mxu1 %v832_v12 }
  0x63   : > { %728 = vmatpush3.bf16.msra.mxu0 %v832_v12  ;;  %761 = vmatpush3.bf16.msra.mxu1 %v832_v12 }
  0x64   : > { %729 = vmatprep.subr.bf16.mxu0 %v833_v13  ;;  %754 = vmatprep.subr.bf16.mxu1 %v833_v13 }
  0x67   : > { %730 = vmatpush3.bf16.msra.mxu0 %v833_v13  ;;  %762 = vmatpush3.bf16.msra.mxu1 %v833_v13 }
  0x6a   : > { %732 = vmatmul.mubr.bf16.vlgmr.msra.gmra.mxu0 %v224_v22  ;;  %740 = vmatmul.mubr.bf16.vlgmr.msra.gmra.mxu1 %v228_v23 }
  0x6b   : > { %735 = vmatprep.mubr.bf16.mxu0 %v225_v24  ;;  %743 = vmatprep.mubr.bf16.mxu1 %v229_v25 }
  0x72   : > { %736 = vmatmul.mubr.bf16.gmra.mxu0 %v226_v30  ;;  %744 = vmatmul.mubr.bf16.gmra.mxu1 %v230_v31 }
 0x12a   : > { %v733_v33 = vpop.f32.mrf.mxu0  ;;  %v741_v34 = vpop.f32.mrf.mxu1 }
 0x12b   : > { %v1220_v35 = vadd.f32 %v733_v33, %v1217_v32  ;;  %v1223_v36 = vadd.f32 %v741_v34, %v1217_v32 }
 0x12c   : > { %v336_v37 = vpop.f32.mrf.mxu0  ;;  %v368_v38 = vpop.f32.mrf.mxu1 }
 0x12d   : > { %v401_v39 = vmul.f32 %v1220_v35, %v1220_v35  ;;  %v409_v40 = vmul.f32 %v1223_v36, %v1223_v36  ;;  %v1230_v41 = vadd.f32 %v1217_v32, %v336_v37  ;;  %v1233_v42 = vadd.f32 %v1217_v32, %v368_v38 }
 0x12e   : > { %v734_v43 = vpop.f32.mrf.mxu0  ;;  %v742_v44 = vpop.f32.mrf.mxu1 }
 0x12f   : > { %v417_v45 = vmul.f32 %v401_v39, %v1220_v35  ;;  %v425_v46 = vmul.f32 %v409_v40, %v1223_v36  ;;  %v399_v47 = vmul.f32 %v1230_v41, %v1230_v41  ;;  %v407_v48 = vmul.f32 %v1233_v42, %v1233_v42 }
 0x130   : > { %v1242_v49 = vadd.f32 %v734_v43, %v1217_v32  ;;  %v1245_v50 = vadd.f32 %v742_v44, %v1217_v32  ;;  %v339_v51 = vpop.f32.mrf.mxu0  ;;  %v371_v52 = vpop.f32.mrf.mxu1 }
 0x131   : > { %v433_v53 = vmul.f32 0.044715, %v417_v45  ;;  %v441_v54 = vmul.f32 0.044715, %v425_v46  ;;  %v415_v55 = vmul.f32 %v399_v47, %v1230_v41  ;;  %v423_v56 = vmul.f32 %v407_v48, %v1233_v42 }
 0x132   : > { %v402_v57 = vmul.f32 %v1242_v49, %v1242_v49  ;;  %v410_v58 = vmul.f32 %v1245_v50, %v1245_v50  ;;  %v1254_v59 = vadd.f32 %v1217_v32, %v339_v51  ;;  %v1257_v60 = vadd.f32 %v1217_v32, %v371_v52  ;;  %v737_v61 = vpop.f32.mrf.mxu0  ;;  %v745_v62 = vpop.f32.mrf.mxu1 }
 0x133   : > { %v449_v63 = vadd.f32 %v433_v53, %v1220_v35  ;;  %v457_v0 = vadd.f32 %v441_v54, %v1223_v36  ;;  %v431_v1 = vmul.f32 0.044715, %v415_v55  ;;  %v439_v2 = vmul.f32 0.044715, %v423_v56 }
 0x134   : > { %v418_v3 = vmul.f32 %v402_v57, %v1242_v49  ;;  %v426_v7 = vmul.f32 %v410_v58, %v1245_v50  ;;  %v400_v9 = vmul.f32 %v1254_v59, %v1254_v59  ;;  %v408_v10 = vmul.f32 %v1257_v60, %v1257_v60  ;;  %v352_v23 = vpop.f32.mrf.mxu0  ;;  %v384_v33 = vpop.f32.mrf.mxu1 }
 0x135   : > { %v465_v11 = vmul.f32 0.7978846, %v449_v63  ;;  %v473_v12 = vmul.f32 0.7978846, %v457_v0  ;;  %v447_v13 = vadd.f32 %v431_v1, %v1230_v41  ;;  %v455_v22 = vadd.f32 %v439_v2, %v1233_v42 }
 0x136   : > { %v434_v24 = vmul.f32 0.044715, %v418_v3  ;;  %v442_v25 = vmul.f32 0.044715, %v426_v7  ;;  %v416_v30 = vmul.f32 %v400_v9, %v1254_v59  ;;  %v424_v31 = vmul.f32 %v408_v10, %v1257_v60  ;;  %v738_v47 = vpop.f32.mrf.mxu0  ;;  %v746_v53 = vpop.f32.mrf.mxu1 }
 0x137   : > { %834 = vtanh.f32 %v465_v11  ;;  %v463_v34 = vmul.f32 0.7978846, %v447_v13  ;;  %v471_v37 = vmul.f32 0.7978846, %v455_v22  ;;  %v1272_v38 = vadd.f32 %v737_v61, %v1217_v32 }
 0x138   : > { %836 = vtanh.f32 %v473_v12  ;;  %v450_v39 = vadd.f32 %v434_v24, %v1242_v49  ;;  %v458_v40 = vadd.f32 %v442_v25, %v1245_v50  ;;  %v432_v43 = vmul.f32 0.044715, %v416_v30  ;;  %v355_v2 = vpop.f32.mrf.mxu0  ;;  %v387_v10 = vpop.f32.mrf.mxu1 }
 0x139   : > { %838 = vtanh.f32 %v463_v34  ;;  %v440_v44 = vmul.f32 0.044715, %v424_v31  ;;  %v405_v45 = vmul.f32 %v1272_v38, %v1272_v38  ;;  %v1279_v46 = vadd.f32 %v745_v62, %v1217_v32 }
 0x13a   : > { %840 = vtanh.f32 %v471_v37  ;;  %v466_v48 = vmul.f32 0.7978846, %v450_v39  ;;  %v474_v51 = vmul.f32 0.7978846, %v458_v40  ;;  %v448_v52 = vadd.f32 %v432_v43, %v1254_v59 }
 0x13b   : > { %v456_v54 = vadd.f32 %v440_v44, %v1257_v60  ;;  %v421_v55 = vmul.f32 %v405_v45, %v1272_v38  ;;  %v413_v56 = vmul.f32 %v1279_v46, %v1279_v46  ;;  %v1287_v57 = vadd.f32 %v1217_v32, %v352_v23 }
 0x13c   : > { %842 = vtanh.f32 %v466_v48  ;;  %v464_v58 = vmul.f32 0.7978846, %v448_v52  ;;  %v1290_v61 = vadd.f32 %v1217_v32, %v384_v33  ;;  %v1293_v62 = vadd.f32 %v738_v47, %v1217_v32 }
 0x13d   : > { %844 = vtanh.f32 %v474_v51  ;;  %v472_v63 = vmul.f32 0.7978846, %v456_v54  ;;  %v437_v0 = vmul.f32 0.044715, %v421_v55  ;;  %v429_v1 = vmul.f32 %v413_v56, %v1279_v46 }
 0x13e   : > { %846 = vtanh.f32 %v464_v58  ;;  %v403_v3 = vmul.f32 %v1287_v57, %v1287_v57  ;;  %v411_v7 = vmul.f32 %v1290_v61, %v1290_v61  ;;  %v406_v9 = vmul.f32 %v1293_v62, %v1293_v62 }
 0x13f   : > { %848 = vtanh.f32 %v472_v63  ;;  %v453_v11 = vadd.f32 %v437_v0, %v1272_v38  ;;  %v445_v12 = vmul.f32 0.044715, %v429_v1  ;;  %v1304_v13 = vadd.f32 %v746_v53, %v1217_v32 }
 0x140   : > { %v419_v22 = vmul.f32 %v403_v3, %v1287_v57  ;;  %v427_v23 = vmul.f32 %v411_v7, %v1290_v61  ;;  %v422_v24 = vmul.f32 %v406_v9, %v1293_v62  ;;  %v1310_v25 = vadd.f32 %v1217_v32, %v355_v2 }
 0x141   : > { %v469_v30 = vmul.f32 0.7978846, %v453_v11  ;;  %v461_v31 = vadd.f32 %v445_v12, %v1279_v46  ;;  %v414_v33 = vmul.f32 %v1304_v13, %v1304_v13  ;;  %v1316_v34 = vadd.f32 %v1217_v32, %v387_v10 }
 0x142   : > { %v435_v37 = vmul.f32 0.044715, %v419_v22  ;;  %v443_v39 = vmul.f32 0.044715, %v427_v23  ;;  %v438_v40 = vmul.f32 0.044715, %v422_v24  ;;  %v404_v43 = vmul.f32 %v1310_v25, %v1310_v25 }
 0x143   : > { %850 = vtanh.f32 %v469_v30  ;;  %v477_v44 = vmul.f32 0.7978846, %v461_v31  ;;  %v430_v45 = vmul.f32 %v414_v33, %v1304_v13  ;;  %v412_v47 = vmul.f32 %v1316_v34, %v1316_v34 }
 0x144   : > { %v835_v48 = vpop.eup %834  ;;  %v451_v51 = vadd.f32 %v435_v37, %v1287_v57  ;;  %v459_v52 = vadd.f32 %v443_v39, %v1290_v61  ;;  %v454_v32 = vadd.f32 %v438_v40, %v1293_v62  ;;  %v420_v53 = vmul.f32 %v404_v43, %v1310_v25 }
 0x145   : > { %v837_v54 = vpop.eup %836  ;;  %v497_v55 = vadd.f32 1.0, %v835_v48  ;;  %852 = vtanh.f32 %v477_v44  ;;  %v446_v56 = vmul.f32 0.044715, %v430_v45  ;;  %v428_v2 = vmul.f32 %v412_v47, %v1316_v34 }
 0x146   : > { %v839_v58 = vpop.eup %838  ;;  %v505_v63 = vadd.f32 1.0, %v837_v54  ;;  %v467_v0 = vmul.f32 0.7978846, %v451_v51  ;;  %v475_v1 = vmul.f32 0.7978846, %v459_v52 }
 0x147   : > { %v841_v3 = vpop.eup %840  ;;  %v513_v7 = vmul.f32 0.5, %v497_v55  ;;  %v495_v9 = vadd.f32 1.0, %v839_v58  ;;  %v470_v10 = vmul.f32 0.7978846, %v454_v32  ;;  %v462_v11 = vadd.f32 %v446_v56, %v1304_v13 }
 0x148   : > { %v521_v12 = vmul.f32 0.5, %v505_v63  ;;  %v503_v22 = vadd.f32 1.0, %v841_v3  ;;  %854 = vtanh.f32 %v467_v0  ;;  %v436_v23 = vmul.f32 0.044715, %v420_v53 }
 0x149   : > { %v843_v24 = vpop.eup %842  ;;  %v529_v30 = vmul.f32 %v513_v7, %v1220_v35  ;;  %v511_v31 = vmul.f32 0.5, %v495_v9  ;;  %856 = vtanh.f32 %v475_v1  ;;  %v478_v33 = vmul.f32 0.7978846, %v462_v11 }
 0x14a   : > { %v845_v37 = vpop.eup %844  ;;  %v537_v39 = vmul.f32 %v521_v12, %v1223_v36  ;;  %v519_v40 = vmul.f32 0.5, %v503_v22  ;;  %v498_v43 = vadd.f32 1.0, %v843_v24  ;;  %858 = vtanh.f32 %v470_v10 }
 0x14b   : > { %v847_v44 = vpop.eup %846  ;;  %v545_v45 = vadd.f32 %v529_v30, %v1167_v14  ;;  %v527_v47 = vmul.f32 %v511_v31, %v1230_v41  ;;  %v506_v48 = vadd.f32 1.0, %v845_v37  ;;  %860 = vtanh.f32 %v478_v33 }
 0x14c   : > { %v849_v51 = vpop.eup %848  ;;  %v553_v35 = vadd.f32 %v537_v39, %v1173_v16  ;;  %v535_v52 = vmul.f32 %v519_v40, %v1233_v42  ;;  %v514_v32 = vmul.f32 0.5, %v498_v43  ;;  %v496_v53 = vadd.f32 1.0, %v847_v44 }
 0x14d   : > { %561 = vst [vmem:[%s1337_s17 + $0x10] sm:$0xff] %v545_v45  ;;  %v543_v14 = vadd.f32 %v527_v47, %v1151_v4  ;;  %v522_v36 = vmul.f32 0.5, %v506_v48  ;;  %v504_v41 = vadd.f32 1.0, %v849_v51  ;;  %v452_v54 = vadd.f32 %v436_v23, %v1310_v25 }
 0x14e   : > { %569 = vst [vmem:[%s1337_s17 + $0x50] sm:$0xff] %v553_v35  ;;  %v551_v16 = vadd.f32 %v535_v52, %v1157_v6  ;;  %v530_v42 = vmul.f32 %v514_v32, %v1242_v49  ;;  %v512_v55 = vmul.f32 0.5, %v496_v53  ;;  %v444_v56 = vmul.f32 0.044715, %v428_v2 }
 0x14f   : > { %559 = vst [vmem:[%s1337_s17] sm:$0xff] %v543_v14  ;;  %v538_v58 = vmul.f32 %v522_v36, %v1245_v50  ;;  %v520_v63 = vmul.f32 0.5, %v504_v41  ;;  %v468_v0 = vmul.f32 0.7978846, %v452_v54 }
 0x150   : > { %v851_v1 = vpop.eup %850  ;;  %567 = vst [vmem:[%s1337_s17 + $0x40] sm:$0xff] %v551_v16  ;;  %v546_v4 = vadd.f32 %v530_v42, %v1170_v15  ;;  %v528_v3 = vmul.f32 %v512_v55, %v1254_v59  ;;  %v460_v6 = vadd.f32 %v444_v56, %v1316_v34 }
 0x151   : > { %v554_v49 = vadd.f32 %v538_v58, %v1176_v17  ;;  %v536_v2 = vmul.f32 %v520_v63, %v1257_v60  ;;  %v501_v7 = vadd.f32 1.0, %v851_v1  ;;  %862 = vtanh.f32 %v468_v0 }
 0x152   : > { %v853_v50 = vpop.eup %852  ;;  %562 = vst [vmem:[%s1337_s17 + $0x18] sm:$0xff] %v546_v4  ;;  %v544_v9 = vadd.f32 %v528_v3, %v1154_v5  ;;  %v476_v10 = vmul.f32 0.7978846, %v460_v6 }
 0x153   : > { %570 = vst [vmem:[%s1337_s17 + $0x58] sm:$0xff] %v554_v49  ;;  %v552_v11 = vadd.f32 %v536_v2, %v1162_v8  ;;  %v517_v15 = vmul.f32 0.5, %v501_v7  ;;  %v509_v12 = vadd.f32 1.0, %v853_v50 }
 0x154   : > { %560 = vst [vmem:[%s1337_s17 + $0x8] sm:$0xff] %v544_v9  ;;  %864 = vtanh.f32 %v476_v10 }
 0x155   : > { %v855_v59 = vpop.eup %854  ;;  %568 = vst [vmem:[%s1337_s17 + $0x48] sm:$0xff] %v552_v11  ;;  %v533_v17 = vmul.f32 %v517_v15, %v1272_v38  ;;  %v525_v60 = vmul.f32 0.5, %v509_v12 }
 0x156   : > { %v857_v22 = vpop.eup %856  ;;  %v499_v23 = vadd.f32 1.0, %v855_v59 }
 0x157   : > { %v859_v24 = vpop.eup %858  ;;  %v549_v5 = vadd.f32 %v533_v17, %v1199_v26  ;;  %v541_v30 = vmul.f32 %v525_v60, %v1279_v46  ;;  %v507_v31 = vadd.f32 1.0, %v857_v22 }
 0x158   : > { %v861_v8 = vpop.eup %860  ;;  %v515_v33 = vmul.f32 0.5, %v499_v23  ;;  %v502_v37 = vadd.f32 1.0, %v859_v24 }
 0x159   : > { %565 = vst [vmem:[%s1337_s17 + $0x30] sm:$0xff] %v549_v5  ;;  %v557_v39 = vadd.f32 %v541_v30, %v1205_v28  ;;  %v523_v40 = vmul.f32 0.5, %v507_v31  ;;  %v510_v38 = vadd.f32 1.0, %v861_v8 }
 0x15a   : > { %v531_v43 = vmul.f32 %v515_v33, %v1287_v57  ;;  %v518_v44 = vmul.f32 0.5, %v502_v37 }
 0x15b   : > { %573 = vst [vmem:[%s1337_s17 + $0x70] sm:$0xff] %v557_v39  ;;  %v539_v26 = vmul.f32 %v523_v40, %v1290_v61  ;;  %v526_v46 = vmul.f32 0.5, %v510_v38 }
 0x15c   : > { %v547_v45 = vadd.f32 %v531_v43, %v1179_v18  ;;  %v534_v47 = vmul.f32 %v518_v44, %v1293_v62 }
 0x15d   : > { %v555_v48 = vadd.f32 %v539_v26, %v1185_v20  ;;  %v542_v28 = vmul.f32 %v526_v46, %v1304_v13 }
 0x15e   : > { %v863_v51 = vpop.eup %862  ;;  %563 = vst [vmem:[%s1337_s17 + $0x20] sm:$0xff] %v547_v45  ;;  %v550_v57 = vadd.f32 %v534_v47, %v1202_v27 }
 0x15f   : > { %571 = vst [vmem:[%s1337_s17 + $0x60] sm:$0xff] %v555_v48  ;;  %v558_v35 = vadd.f32 %v542_v28, %v1208_v29  ;;  %v500_v61 = vadd.f32 1.0, %v863_v51 }
 0x160   : > { %566 = vst [vmem:[%s1337_s17 + $0x38] sm:$0xff] %v550_v57 }
 0x161   : > { %v865_v18 = vpop.eup %864  ;;  %574 = vst [vmem:[%s1337_s17 + $0x78] sm:$0xff] %v558_v35  ;;  %v516_v62 = vmul.f32 0.5, %v500_v61 }
 0x162   : > { %v508_v20 = vadd.f32 1.0, %v865_v18 }
 0x163   : > { %v532_v52 = vmul.f32 %v516_v62, %v1310_v25 }
 0x164   : > { %v524_v13 = vmul.f32 0.5, %v508_v20 }
 0x165   : > { %v548_v32 = vadd.f32 %v532_v52, %v1182_v19 }
 0x166   : > { %v540_v27 = vmul.f32 %v524_v13, %v1316_v34 }
 0x167   : > { %564 = vst [vmem:[%s1337_s17 + $0x28] sm:$0xff] %v548_v32 }
 0x168   : > { %v556_v29 = vadd.f32 %v540_v27, %v1188_v21 }
 0x16a   : > { %572 = vst [vmem:[%s1337_s17 + $0x68] sm:$0xff] %v556_v29 }
 0x16b   : > { %933 = shalt.err (!%p930_p0)
}
 0x16c   : > { %s934_s11 = scalar_lea.hbm %s1386_s4, 2048  ;;  %s938_s28 = scalar_lea.hbm %s1435_s3, 8192 }
 0x16d   : > { %p935_p5 = scmp.ne.s32.totalorder %s1386_s4, %s934_s11  ;;  %p939_p4 = scmp.lt.s32.totalorder %s1386_s4, %s1435_s3 }
 0x16e   : > { %p940_p6 = scmp.lt.s32.totalorder %s938_s28, %s934_s11 }
 0x16f   : > { %p936_p9 = pnand %p935_p5, %p1451_p10 }
 0x170   : > { %p941_p8 = por %p940_p6, %p939_p4 }
 0x171   : > { %p937_p1 = pneg %p936_p9 }
 0x173   : > { %p942_p3 = pnand %p941_p8, %p937_p1 }
 0x175   : > { %945 = shalt.err (!%p942_p3)
}
 0x176   : > { %s997_s20 = smov 128   ;;  %s998_s17 = smov 8  }
 0x177   : > { %769 = dma.vmem_to_hbm [thread:$0]  (%p1451_p10), %s1388_s23, 2048, %s1386_s4, %s576_s16, %s997_s20, %s997_s20, %s998_s17  }
 0x178 PF: > { %p786_p7 = scmp.ge.s32.totalorder %s988_s15, 2  ;;  %s604_s22 = sand.u32 1, %s976_s12  }
 0x179   : > { %p1452_p11 = scmp.ne.s32.totalorder %s1441_s19, 0  ;;  %s605_s25 = scalar_lea.sflag [#allocation4], %s604_s22 }
 0x17b   : > { %p780_p12 = pnand %p786_p7, %p1452_p11 }
 0x17d   : > { %p781_p2 = pneg %p780_p12 }
 0x17f   : > { %971 = dma.done.wait (%p781_p2), %s605_s25, 2048  }
 0x180   : > { %973 = vsyncadd (%p781_p2), %s605_s25, 4294965248  ;;  %p17_p13 = scmp.ge.s32.totalorder %s1072_s24, 6   ;;  %s1453_s12 = smov %s980_s13 }
 0x181   : > { %s1454_s13 = smov %s984_s14  ;;  %s1455_s14 = smov %s1089_s5 }
 0x182   : > { %s1456_s15 = smov %s1072_s24  ;;  %19 = sbr.rel (!%p17_p13) target bundleno = 6 (0x6), region = 81 }
 0x187   :  { %610 = vsyncpa [#allocation3], 1 }
 0x188   :  { %612 = vsyncpa [#allocation3 + $0x1], 1 }
 0x189   :  { %613 = vsyncpa [#allocation6], 1 }
 0x18a   :  { %614 = vsyncpa [#allocation4], 1 }
 0x18b   :  { %616 = vsyncpa [#allocation4 + $0x1], 1 }

</bundles_post_ra>
